<compile_context>
chip_gen: v7x
topology: tpu7x:2x2x1
jax: 0.10.0
libtpu: 0.0.40
codegen_flags: <defaults>
</compile_context>

<pallas_src>
import functools
import math

import jax
import jax.numpy as jnp
from jax import lax
from jax.experimental import pallas as pl
from jax.experimental.pallas import tpu as pltpu

_LANES = 128
_SUBLANES = 8


def _focal_elementwise(x, t_raw, *, gamma, ignore_index, pos_weight):
    """Fused per-element binary focal loss (f32, VPU/EUP only)."""
    t = jnp.where(t_raw == ignore_index, 0.0, t_raw)
    if pos_weight is not None:
        w = t * (float(pos_weight) - 1.0) + 1.0
    else:
        w = t + 2.0
    # numerically stable BCE-with-logits: x - x*t + max(-x,0) + log(1+exp(-|x|))
    bce = x - x * t + jnp.maximum(-x, 0.0) + jnp.log(1.0 + jnp.exp(-jnp.abs(x)))
    # focal modulation factor
    z = -x * (t * 2.0 - 1.0)
    g_int = int(round(float(gamma)))
    if abs(float(gamma) - g_int) < 1e-12 and 1 <= g_int <= 8:
        s = 1.0 / (1.0 + jnp.exp(-z))          # sigmoid(z)
        foc = s
        for _ in range(g_int - 1):             # s ** gamma via cheap VPU muls
            foc = foc * s
    else:
        logsig = jnp.minimum(z, 0.0) - jnp.log(1.0 + jnp.exp(-jnp.abs(z)))
        foc = jnp.exp(logsig * float(gamma))
    return foc * bce * w


def _focal_sum_kernel(x_ref, t_ref, psum_ref, *, gamma, ignore_index, pos_weight,
                      block_rows, valid_elems):
    x = x_ref[...].astype(jnp.float32)
    t = t_ref[...].astype(jnp.float32)
    loss = _focal_elementwise(x, t, gamma=gamma, ignore_index=ignore_index,
                              pos_weight=pos_weight)
    # zero out padded tail elements so they do not contribute to the mean
    row0 = pl.program_id(0) * block_rows
    rows = lax.broadcasted_iota(jnp.int32, loss.shape, 0) + row0
    cols = lax.broadcasted_iota(jnp.int32, loss.shape, 1)
    loss = jnp.where(rows * _LANES + cols < valid_elems, loss, 0.0)
    # per-block partial sum: collapse sublane groups onto one (8,128) vreg with
    # plain VPU adds; the final cross-lane reduce happens outside the kernel.
    psum_ref[0] = jnp.sum(
        loss.reshape(block_rows // _SUBLANES, _SUBLANES, _LANES), axis=0)


def _focal_elem_kernel(x_ref, t_ref, o_ref, *, gamma, ignore_index, pos_weight):
    x = x_ref[...].astype(jnp.float32)
    t = t_ref[...].astype(jnp.float32)
    o_ref[...] = _focal_elementwise(
        x, t, gamma=gamma, ignore_index=ignore_index, pos_weight=pos_weight,
    ).astype(o_ref.dtype)


def binary_focal_loss(logits, target, *, gamma=2.0, ignore_index=-100,
                      pos_weight=None, reduction=True, block_rows=1024):
    """Pallas TPU implementation of BinaryFocalLoss.forward."""
    # TODO(synk): the optional per-element `weight` tensor argument of the
    # PyTorch forward is not plumbed through (only pos_weight / default path).
    assert logits.shape == target.shape, (logits.shape, target.shape)
    m = math.prod(logits.shape)

    x = logits.reshape(-1).astype(jnp.float32)
    t = target.reshape(-1).astype(jnp.float32)

    # lane-dense (rows, 128) layout, sublane-aligned rows, cdiv grid + padding
    rows = pl.cdiv(m, _LANES)
    rows = pl.cdiv(rows, _SUBLANES) * _SUBLANES
    blk = max(_SUBLANES, min(int(block_rows), rows))
    blk = (blk // _SUBLANES) * _SUBLANES
    num_blocks = pl.cdiv(rows, blk)
    rows_total = num_blocks * blk

    pad = rows_total * _LANES - m
    if pad:
        x = jnp.pad(x, (0, pad))
        t = jnp.pad(t, (0, pad))
    x2 = x.reshape(rows_total, _LANES)
    t2 = t.reshape(rows_total, _LANES)

    cparams = pltpu.CompilerParams(
        dimension_semantics=("parallel",),           # blocks independent (v7x 2 TCs)
        vmem_limit_bytes=32 * 1024 * 1024,           # safe on v5e/v6e/v7x
    )
    in_specs = [
        pl.BlockSpec((blk, _LANES), lambda i: (i, 0)),
        pl.BlockSpec((blk, _LANES), lambda i: (i, 0)),
    ]

    if reduction:
        kernel = functools.partial(
            _focal_sum_kernel, gamma=float(gamma),
            ignore_index=float(ignore_index), pos_weight=pos_weight,
            block_rows=blk, valid_elems=m)
        psums = pl.pallas_call(
            kernel,
            out_shape=jax.ShapeDtypeStruct(
                (num_blocks, _SUBLANES, _LANES), jnp.float32),
            grid_spec=pltpu.PrefetchScalarGridSpec(
                num_scalar_prefetch=0,
                grid=(num_blocks,),
                in_specs=in_specs,
                out_specs=pl.BlockSpec((1, _SUBLANES, _LANES),
                                       lambda i: (i, 0, 0)),
            ),
            compiler_params=cparams,
        )(x2, t2)
        return jnp.sum(psums) / m

    kernel = functools.partial(
        _focal_elem_kernel, gamma=float(gamma),
        ignore_index=float(ignore_index), pos_weight=pos_weight)
    loss2 = pl.pallas_call(
        kernel,
        out_shape=jax.ShapeDtypeStruct((rows_total, _LANES), jnp.float32),
        grid_spec=pltpu.PrefetchScalarGridSpec(
            num_scalar_prefetch=0,
            grid=(num_blocks,),
            in_specs=in_specs,
            out_specs=pl.BlockSpec((blk, _LANES), lambda i: (i, 0)),
        ),
        compiler_params=cparams,
    )(x2, t2)
    # Kernel stores stay 128-lane dense; the PyTorch-style (-1, 1) view is done
    # as cheap flatten/slice/reshape metadata ops outside the kernel.
    return loss2.reshape(-1)[:m].reshape(-1, 1)


def _reference(logits, target, gamma=2.0, ignore_index=-100, reduction=True):
    """Pure-JAX transcription of the PyTorch forward."""
    tgt = target.astype(jnp.float32)
    tgt = tgt * (tgt != ignore_index).astype(jnp.float32)
    x = logits.reshape(-1, 1).astype(jnp.float32)
    t = tgt.reshape(-1, 1)
    w = t + 2.0
    max_val = jnp.maximum(-x, 0.0)
    loss = x - x * t + max_val + jnp.log(
        jnp.exp(-max_val) + jnp.exp(-x - max_val))
    invprobs = jax.nn.log_sigmoid(-x * (t * 2.0 - 1.0))
    loss = jnp.exp(invprobs * gamma) * loss
    loss = loss * w
    return loss.mean() if reduction else loss


if __name__ == "__main__":
    key = jax.random.PRNGKey(0)
    k1, k2, k3 = jax.random.split(key, 3)

    shape = (2, 4, 16, 16)   # (batch, channels, H, W) -> 2048 elements
    logits = jax.random.normal(k1, shape, dtype=jnp.float32) * 2.0
    target = jax.random.bernoulli(k2, p=0.3, shape=shape).astype(jnp.float32)
    # sprinkle some ignore_index entries to exercise that path
    ignore_mask = jax.random.bernoulli(k3, p=0.05, shape=shape)
    target = jnp.where(ignore_mask, -100.0, target)

    mean = binary_focal_loss(logits, target, gamma=2.0, reduction=True)
    mean = jax.block_until_ready(mean)
    elem = binary_focal_loss(logits, target, gamma=2.0, reduction=False)
    elem = jax.block_until_ready(elem)

    ref_mean = _reference(logits, target, gamma=2.0)
    ref_elem = _reference(logits, target, gamma=2.0, reduction=False)

    assert elem.shape == (math.prod(shape), 1), elem.shape
    assert jnp.allclose(mean, ref_mean, rtol=1e-5, atol=1e-6), (mean, ref_mean)
    assert jnp.allclose(elem, ref_elem, rtol=1e-5, atol=1e-5), float(
        jnp.max(jnp.abs(elem - ref_elem)))

    print("KERNEL_OK")
</pallas_src>

<mosaic_0001>
module attributes {stable_mosaic.version = 11 : i64} {
  func.func @_focal_sum_kernel(%arg0: i32, %arg1: memref<16x128xf32, #tpu.memory_space<vmem>>, %arg2: memref<16x128xf32, #tpu.memory_space<vmem>>, %arg3: memref<1x8x128xf32, #tpu.memory_space<vmem>>) attributes {dimension_semantics = [#tpu.dimension_semantics<parallel>], iteration_bounds = array<i64: 1>, scalar_prefetch = 0 : i64, scratch_operands = 0 : i64, tpu.core_type = #tpu.core_type<tc>, window_params = [{transform_indices = @transform_0, window_bounds = array<i64: 16, 128>}, {transform_indices = @transform_1, window_bounds = array<i64: 16, 128>}, {transform_indices = @transform_2, window_bounds = array<i64: 1, 8, 128>}]} {
    %c0 = arith.constant 0 : index
    %c0_0 = arith.constant 0 : index
    %0 = vector.load %arg1[%c0, %c0_0] : memref<16x128xf32, #tpu.memory_space<vmem>>, vector<16x128xf32>
    %c0_1 = arith.constant 0 : index
    %c0_2 = arith.constant 0 : index
    %1 = vector.load %arg2[%c0_1, %c0_2] : memref<16x128xf32, #tpu.memory_space<vmem>>, vector<16x128xf32>
    %cst = arith.constant -1.000000e+02 : f32
    %2 = vector.broadcast %cst : f32 to vector<16x128xf32>
    %3 = arith.cmpf oeq, %1, %2 : vector<16x128xf32>
    %cst_3 = arith.constant 0.000000e+00 : f32
    %4 = vector.broadcast %cst_3 : f32 to vector<16x128xf32>
    %5 = arith.select %3, %4, %1 : vector<16x128xi1>, vector<16x128xf32>
    %cst_4 = arith.constant 2.000000e+00 : f32
    %6 = vector.broadcast %cst_4 : f32 to vector<16x128xf32>
    %7 = arith.addf %5, %6 : vector<16x128xf32>
    %8 = arith.mulf %0, %5 : vector<16x128xf32>
    %9 = arith.subf %0, %8 : vector<16x128xf32>
    %cst_5 = arith.constant 0.000000e+00 : f32
    %10 = vector.broadcast %cst_5 : f32 to vector<16x128xf32>
    %11 = arith.subf %10, %0 : vector<16x128xf32>
    %cst_6 = arith.constant 0.000000e+00 : f32
    %12 = vector.broadcast %cst_6 : f32 to vector<16x128xf32>
    %13 = arith.maximumf %11, %12 : vector<16x128xf32>
    %14 = arith.addf %9, %13 : vector<16x128xf32>
    %15 = math.absf %0 : vector<16x128xf32>
    %cst_7 = arith.constant 0.000000e+00 : f32
    %16 = vector.broadcast %cst_7 : f32 to vector<16x128xf32>
    %17 = arith.subf %16, %15 : vector<16x128xf32>
    %18 = math.exp %17 : vector<16x128xf32>
    %cst_8 = arith.constant 1.000000e+00 : f32
    %19 = vector.broadcast %cst_8 : f32 to vector<16x128xf32>
    %20 = arith.addf %19, %18 : vector<16x128xf32>
    %21 = math.log %20 : vector<16x128xf32>
    %22 = arith.addf %14, %21 : vector<16x128xf32>
    %cst_9 = arith.constant 0.000000e+00 : f32
    %23 = vector.broadcast %cst_9 : f32 to vector<16x128xf32>
    %24 = arith.subf %23, %0 : vector<16x128xf32>
    %cst_10 = arith.constant 2.000000e+00 : f32
    %25 = vector.broadcast %cst_10 : f32 to vector<16x128xf32>
    %26 = arith.mulf %5, %25 : vector<16x128xf32>
    %cst_11 = arith.constant 1.000000e+00 : f32
    %27 = vector.broadcast %cst_11 : f32 to vector<16x128xf32>
    %28 = arith.subf %26, %27 : vector<16x128xf32>
    %29 = arith.mulf %24, %28 : vector<16x128xf32>
    %cst_12 = arith.constant 0.000000e+00 : f32
    %30 = vector.broadcast %cst_12 : f32 to vector<16x128xf32>
    %31 = arith.subf %30, %29 : vector<16x128xf32>
    %32 = math.exp %31 : vector<16x128xf32>
    %cst_13 = arith.constant 1.000000e+00 : f32
    %33 = vector.broadcast %cst_13 : f32 to vector<16x128xf32>
    %34 = arith.addf %33, %32 : vector<16x128xf32>
    %cst_14 = arith.constant 1.000000e+00 : f32
    %35 = vector.broadcast %cst_14 : f32 to vector<16x128xf32>
    %36 = arith.divf %35, %34 : vector<16x128xf32>
    %37 = arith.mulf %36, %36 : vector<16x128xf32>
    %38 = arith.mulf %37, %22 : vector<16x128xf32>
    %39 = arith.mulf %38, %7 : vector<16x128xf32>
    %c16_i32 = arith.constant 16 : i32
    %40 = arith.muli %arg0, %c16_i32 : i32
    %41 = tpu.iota {dimensions = array<i32: 0>} : vector<16x128xi32>
    %42 = vector.broadcast %40 : i32 to vector<16x128xi32>
    %43 = arith.addi %41, %42 : vector<16x128xi32>
    %44 = tpu.iota {dimensions = array<i32: 1>} : vector<16x128xi32>
    %c128_i32 = arith.constant 128 : i32
    %45 = vector.broadcast %c128_i32 : i32 to vector<16x128xi32>
    %46 = arith.muli %43, %45 : vector<16x128xi32>
    %47 = arith.addi %46, %44 : vector<16x128xi32>
    %c2048_i32 = arith.constant 2048 : i32
    %48 = vector.broadcast %c2048_i32 : i32 to vector<16x128xi32>
    %49 = arith.cmpi slt, %47, %48 : vector<16x128xi32>
    %cst_15 = arith.constant 0.000000e+00 : f32
    %50 = vector.broadcast %cst_15 : f32 to vector<16x128xf32>
    %51 = arith.select %49, %39, %50 : vector<16x128xi1>, vector<16x128xf32>
    %52 = vector.shape_cast %51 : vector<16x128xf32> to vector<2x8x128xf32>
    %cst_16 = arith.constant dense<0.000000e+00> : vector<8x128xf32>
    %53 = vector.multi_reduction <add>, %52, %cst_16 [0] : vector<2x8x128xf32> to vector<8x128xf32>
    %c0_17 = arith.constant 0 : index
    %c0_18 = arith.constant 0 : index
    %c0_19 = arith.constant 0 : index
    %54 = vector.load %arg3[%c0_17, %c0_18, %c0_19] : memref<1x8x128xf32, #tpu.memory_space<vmem>>, vector<1x8x128xf32>
    %55 = vector.shape_cast %54 : vector<1x8x128xf32> to vector<8x128xf32>
    %56 = vector.shape_cast %53 : vector<8x128xf32> to vector<1x8x128xf32>
    tpu.vector_store %arg3[%c0_17, %c0_18, %c0_19], %56 {strides = array<i32>} : memref<1x8x128xf32, #tpu.memory_space<vmem>>, vector<1x8x128xf32>,
    return
  }
  func.func @transform_0(%arg0: i32) -> (i32, i32) {
    %c0_i32 = arith.constant 0 : i32
    %c0_i32_0 = arith.constant 0 : i32
    return %arg0, %c0_i32 : i32, i32
  }
  func.func @transform_1(%arg0: i32) -> (i32, i32) {
    %c0_i32 = arith.constant 0 : i32
    %c0_i32_0 = arith.constant 0 : i32
    return %arg0, %c0_i32 : i32, i32
  }
  func.func @transform_2(%arg0: i32) -> (i32, i32, i32) {
    %c0_i32 = arith.constant 0 : i32
    %c0_i32_0 = arith.constant 0 : i32
    %c0_i32_1 = arith.constant 0 : i32
    return %arg0, %c0_i32, %c0_i32_0 : i32, i32, i32
  }
}

</mosaic_0001>

<bundles_post_ra>
// kernel: tpu_custom_call.1
= control target key start
LH: loop header
LB: loop body
LE: loop exit
PB: predicated region body
PF: predicated region fallthrough
CT: control target
= control target key end

     0   :  { %7 = vsyncpa [#allocation3], 0  ;;  %s286_s0 = inlined_call_operand.hbm [shape: f32[16,128], index: 0, kind: input, shape index: {}]   ;;  %s287_s1 = inlined_call_operand.hbm [shape: f32[16,128], index: 1, kind: input, shape index: {}]   ;;  %s288_s2 = inlined_call_operand.hbm [shape: f32[1,8,128], index: 2, kind: output, shape index: {}]  }
   0x1   :  { %8 = vsyncpa [#allocation6], 0 }
   0x2   :  { %9 = vsyncpa [#allocation4], 0  ;;  %s230_s9 = smov [#allocation2]   ;;  %s158_s13 = scalar_lea.hbm %s286_s0, 256 }
   0x3   :  { %s15_s10 = sshll.u32 %s230_s9, 4  ;;  %p159_p0 = scmp.ne.s32.totalorder %s286_s0, %s158_s13  ;;  %s16_s10 = int_to_ptr.vmem [resolvable:$true] %s15_s10 }
   0x4   :  { %p162_p1 = scmp.lt.u32.totalorder %s158_s13, %s286_s0 }
   0x6   :  { %p164_p2 = pnand %p162_p1, %p159_p0 }
   0x8   :  { %167 = shalt.err (!%p164_p2)
}
   0x9   :  { %s168_s18 = scalar_lea.vmem %s16_s10, 256  ;;  %p173_p4 = scmp.lt.s32.totalorder %s16_s10, %s16_s10 }
   0xa   :  { %p169_p3 = scmp.ne.s32.totalorder %s16_s10, %s168_s18  ;;  %p174_p5 = scmp.lt.s32.totalorder %s168_s18, %s168_s18 }
   0xc   :  { %p175_p6 = por %p174_p5, %p173_p4 }
   0xe   :  { %p176_p7 = pnand %p175_p6, %p169_p3 }
  0x10   :  { %179 = shalt.err (!%p176_p7)
}
  0x11   :  { %s231_s19 = smov 128   ;;  %s232_s20 = smov 8  }
  0x12   :  { %21 = dma.hbm_to_vmem [thread:$0]  %s286_s0, 256, %s16_s10, [#allocation3], %s231_s19, %s231_s19, %s232_s20  }
  0x13   :  { %s233_s23 = smov [#allocation5]   ;;  %s180_s27 = scalar_lea.hbm %s287_s1, 256 }
  0x14   :  { %s27_s24 = sshll.u32 %s233_s23, 4  ;;  %p181_p8 = scmp.ne.s32.totalorder %s287_s1, %s180_s27  ;;  %s28_s24 = int_to_ptr.vmem [resolvable:$true] %s27_s24 }
  0x15   :  { %p184_p9 = scmp.lt.u32.totalorder %s180_s27, %s287_s1 }
  0x17   :  { %p186_p10 = pnand %p184_p9, %p181_p8 }
  0x19   :  { %189 = shalt.err (!%p186_p10)
}
  0x1a   :  { %s190_s4 = scalar_lea.vmem %s28_s24, 256  ;;  %p195_p12 = scmp.lt.s32.totalorder %s28_s24, %s28_s24 }
  0x1b   :  { %p191_p11 = scmp.ne.s32.totalorder %s28_s24, %s190_s4  ;;  %p196_p13 = scmp.lt.s32.totalorder %s190_s4, %s190_s4 }
  0x1d   :  { %p197_p0 = por %p196_p13, %p195_p12 }
  0x1f   :  { %p198_p1 = pnand %p197_p0, %p191_p11 }
  0x21   :  { %201 = shalt.err (!%p198_p1)
}
  0x22   :  { %33 = dma.hbm_to_vmem [thread:$0]  %s287_s1, 256, %s28_s24, [#allocation6], %s231_s19, %s231_s19, %s232_s20  }
  0x23   :  { %224 = dma.done.wait [#allocation3], 256  }
  0x24   :  { %225 = vsyncadd [#allocation3], 4294967040 }
  0x25   :  { %226 = dma.done.wait [#allocation6], 256  }
  0x26   :  { %227 = vsyncadd [#allocation6], 4294967040  ;;  %v40_v0 = vld [vmem:[#allocation2] sm:$0xff]  ;;  %v41_v1 = vld [vmem:[#allocation2 + $0x8] sm:$0xff]  ;;  %v101_v28 = vlaneseq  ;;  %s234_s1 = smov [#allocation7]  }
  0x27   :  { %v42_v2 = vld [vmem:[#allocation5] sm:$0xff]  ;;  %v43_v3 = vld [vmem:[#allocation5 + $0x8] sm:$0xff]  ;;  %v60_v4 = vand.u32 2147483647, %v40_v0  ;;  %v61_v6 = vand.u32 2147483647, %v41_v1 }
  0x28   :  { %vm44_vm0 = vcmp.eq.f32.partialorder %v42_v2, -100.0  ;;  %vm45_vm1 = vcmp.eq.f32.partialorder %v43_v3, -100.0  ;;  %v54_v8 = vsub.f32 0.0, %v40_v0  ;;  %v55_v10 = vsub.f32 0.0, %v41_v1  ;;  %s125_s6 = sshll.u32 %s234_s1, 4  ;;  %s126_s6 = int_to_ptr.vmem [resolvable:$true] %s125_s6 }
  0x29   :  { %v46_v5 = vsel %vm44_vm0, 0.0, %v42_v2  ;;  %v47_v7 = vsel %vm45_vm1, 0.0, %v43_v3  ;;  %v62_v9 = vsub.f32 0.0, %v60_v4  ;;  %v63_v11 = vsub.f32 0.0, %v61_v6  ;;  %s202_s7 = scalar_lea.vmem %s126_s6, 128  ;;  %p207_p3 = scmp.lt.s32.totalorder %s126_s6, %s126_s6 }
  0x2a   :  { %v76_v12 = vmul.f32 2.0, %v46_v5  ;;  %v77_v13 = vmul.f32 2.0, %v47_v7  ;;  %v50_v30 = vmul.f32 %v46_v5, %v40_v0  ;;  %v51_v32 = vmul.f32 %v47_v7, %v41_v1  ;;  %p203_p2 = scmp.ne.s32.totalorder %s126_s6, %s202_s7  ;;  %p208_p4 = scmp.lt.s32.totalorder %s202_s7, %s202_s7 }
  0x2b   :  { %v64_v14 = vmul.f32 1.442695, %v62_v9  ;;  %v66_v15 = vmul.f32 1.442695, %v63_v11  ;;  %v102_v35 = vshrl.u32 %v101_v28, 7  ;;  %v56_v37 = vmax.f32 %v54_v8, 0.0 }
  0x2c   :  { %v135_v16 = vadd.f32 -1.0, %v76_v12  ;;  %v136_v17 = vadd.f32 -1.0, %v77_v13  ;;  %v52_v36 = vsub.f32 %v40_v0, %v50_v30  ;;  %v53_v38 = vsub.f32 %v41_v1, %v51_v32  ;;  %p209_p5 = por %p208_p4, %p207_p3 }
  0x2d   :  { %142 = vpow2.f32 %v64_v14  ;;  %v57_v39 = vmax.f32 %v55_v10, 0.0  ;;  %v103_v41 = vadd.s32 8, %v102_v35  ;;  %v108_v47 = vand.u32 127, %v101_v28 }
  0x2e   :  { %144 = vpow2.f32 %v66_v15  ;;  %v80_v18 = vmul.f32 %v135_v16, %v54_v8  ;;  %v81_v19 = vmul.f32 %v136_v17, %v55_v10  ;;  %v58_v43 = vadd.f32 %v56_v37, %v52_v36  ;;  %p210_p6 = pnand %p209_p5, %p203_p2 }
  0x2f   :  { %v59_v45 = vadd.f32 %v57_v39, %v53_v38  ;;  %v109_v48 = vmul.u32 128, %v102_v35  ;;  %v110_v49 = vmul.u32 128, %v103_v41  ;;  %v48_v55 = vadd.f32 2.0, %v46_v5 }
  0x30   :  { %v82_v20 = vsub.f32 0.0, %v80_v18  ;;  %v83_v21 = vsub.f32 0.0, %v81_v19  ;;  %v49_v58 = vadd.f32 2.0, %v47_v7 }
  0x31   :  { %v111_v53 = vadd.s32 %v109_v48, %v108_v47  ;;  %v112_v57 = vadd.s32 %v110_v49, %v108_v47 }
  0x32   :  { %v84_v22 = vmul.f32 1.442695, %v82_v20  ;;  %v86_v23 = vmul.f32 1.442695, %v83_v21 }
  0x33   :  { %vm113_vm2 = vcmp.lt.s32.totalorder %v111_v53, 2048  ;;  %vm114_vm3 = vcmp.lt.s32.totalorder %v112_v57, 2048 }
  0x34   :  { %146 = vpow2.f32 %v84_v22 }
  0x35   :  { %148 = vpow2.f32 %v86_v23 }
  0x37   :  { %v143_v24 = vpop.eup %142 }
  0x38   :  { %v145_v25 = vpop.eup %144  ;;  %v68_v26 = vadd.f32 1.0, %v143_v24 }
  0x39   :  { %v69_v27 = vadd.f32 1.0, %v145_v25 }
  0x3a   :  { %150 = vlog2.f32 %v68_v26 }
  0x3b   :  { %152 = vlog2.f32 %v69_v27 }
  0x3e   :  { %v147_v29 = vpop.eup %146 }
  0x3f   :  { %v149_v31 = vpop.eup %148  ;;  %v88_v33 = vadd.f32 1.0, %v147_v29 }
  0x40   :  { %v89_v34 = vadd.f32 1.0, %v149_v31 }
  0x41   :  { %154 = vrcp.f32 %v88_v33 }
  0x42   :  { %156 = vrcp.f32 %v89_v34 }
  0x44   :  { %v151_v40 = vpop.eup %150 }
  0x45   :  { %v153_v42 = vpop.eup %152  ;;  %v71_v44 = vmul.f32 0.6931472, %v151_v40 }
  0x46   :  { %v73_v46 = vmul.f32 0.6931472, %v153_v42 }
  0x47   :  { %v74_v50 = vadd.f32 %v71_v44, %v58_v43 }
  0x48   :  { %v75_v52 = vadd.f32 %v73_v46, %v59_v45 }
  0x4b   :  { %v155_v51 = vpop.eup %154 }
  0x4c   :  { %v157_v54 = vpop.eup %156  ;;  %v94_v56 = vmul.f32 %v155_v51, %v155_v51 }
  0x4d   :  { %v95_v59 = vmul.f32 %v157_v54, %v157_v54 }
  0x4e   :  { %v96_v60 = vmul.f32 %v94_v56, %v74_v50 }
  0x4f   :  { %v97_v61 = vmul.f32 %v95_v59, %v75_v52 }
  0x50   :  { %v98_v62 = vmul.f32 %v96_v60, %v48_v55 }
  0x51   :  { %v99_v63 = vmul.f32 %v97_v61, %v49_v58 }
  0x52   :  { %v115_v0 = vsel %vm113_vm2, %v98_v62, 0.0 }
  0x53   :  { %v116_v1 = vsel %vm114_vm3, %v99_v63, 0.0 }
  0x54   :  { %v117_v2 = vadd.f32 %v116_v1, %v115_v0 }
  0x56   :  { %118 = vst [vmem:[#allocation7] sm:$0xff] %v117_v2 }
  0x57   :  { %213 = shalt.err (!%p210_p6)
}
  0x58   :  { %s214_s10 = scalar_lea.hbm %s288_s2, 128 }
  0x59   :  { %p215_p7 = scmp.ne.s32.totalorder %s288_s2, %s214_s10  ;;  %p218_p8 = scmp.lt.u32.totalorder %s214_s10, %s288_s2 }
  0x5b   :  { %p220_p9 = pnand %p218_p8, %p215_p7 }
  0x5d   :  { %223 = shalt.err (!%p220_p9)
}
  0x5e   :  { %128 = dma.vmem_to_hbm [thread:$0]  %s126_s6, 128, %s288_s2, [#allocation4]  }
  0x5f   :  { %228 = dma.done.wait [#allocation4], 128  }
  0x60   :  { %229 = vsyncadd [#allocation4], 4294967168 }
  0x61   :  { %132 = vsyncpa [#allocation3], 1 }
  0x62   :  { %133 = vsyncpa [#allocation6], 1 }
  0x63   :  { %134 = vsyncpa [#allocation4], 1 }

</bundles_post_ra>
